<compile_context>
chip_gen: v7x
topology: tpu7x:2x2x1
jax: 0.10.0
libtpu: 0.0.40
codegen_flags: <defaults>
</compile_context>

<pallas_src>
import functools
import math

import jax
import jax.numpy as jnp
from jax.experimental import pallas as pl
from jax.experimental.pallas import tpu as pltpu


def _round_up(v, m):
    return ((v + m - 1) // m) * m


def _linear_kernel(x_ref, w_ref, b_ref, o_ref, *, compute_dtype):
    # x_ref: (tile_rows, KP)  w_ref: (KP, NP)  b_ref: (1, NP) f32  o_ref: (tile_rows, NP)
    x = x_ref[...]
    if compute_dtype is not None:
        x = x.astype(compute_dtype)          # in-kernel cast: free on the VPU, no extra HBM pass
    acc = jnp.dot(x, w_ref[...], preferred_element_type=jnp.float32)
    acc = acc + b_ref[...]                   # bias already f32
    o_ref[...] = acc.astype(o_ref.dtype)


def distortion_transform(x, weight, bias, *, tile_m=8192, compute_dtype=None,
                         out_dtype=None):
    """y = x @ weight.T + bias over the last axis of x (== nn.Linear forward).

    x:      (..., in_dims)
    weight: (out_dims, in_dims)   -- PyTorch nn.Linear convention
    bias:   (out_dims,)
    compute_dtype: optional matmul dtype (e.g. jnp.bfloat16); x is cast *inside* the
      kernel, only the small weight is cast in the wrapper; accumulation stays f32.
    out_dtype: optional output dtype (e.g. jnp.bfloat16 to halve output HBM traffic);
      defaults to x.dtype.
    """
    in_dims = x.shape[-1]
    out_dims = weight.shape[0]
    assert weight.shape == (out_dims, in_dims)
    assert bias.shape == (out_dims,)

    lead_shape = x.shape[:-1]
    M = math.prod(lead_shape) if lead_shape else 1
    out_dtype = x.dtype if out_dtype is None else out_dtype

    # Lane-packing factor for the contraction dim (only when in_dims divides 128).
    if 0 < in_dims <= 128 and 128 % in_dims == 0:
        pack = 128 // in_dims
    else:
        pack = 1                      # TODO(synk): general in_dims falls back to unpacked K

    x2 = x.reshape(M, in_dims)
    M_eff = M
    if pack > 1 and M % pack != 0:
        # Rare: pad a handful of rows so the packed byte-reinterpretation stays valid.
        extra = pack - M % pack
        x2 = jnp.pad(x2, ((0, extra), (0, 0)))
        M_eff = M + extra

    KP = pack * in_dims               # 128 in the packed path
    NP = pack * out_dims
    MP = M_eff // pack                # packed row count

    w_t = jnp.transpose(weight)                               # (in_dims, out_dims)
    if compute_dtype is not None:
        w_t = w_t.astype(compute_dtype)                        # tiny; cast here is cheap
    if pack > 1:
        w_in = jnp.kron(jnp.eye(pack, dtype=w_t.dtype), w_t)   # (KP, NP) block-diagonal
        b_in = jnp.tile(bias, pack).reshape(1, NP).astype(jnp.float32)
        x_in = x2.reshape(MP, KP)                              # free: same byte layout
    else:
        w_in = w_t
        b_in = bias.reshape(1, NP).astype(jnp.float32)
        x_in = x2

    # Row tile in *packed* rows: big enough to amortize per-step overhead, kept within
    # a per-buffer VMEM budget, and capped so the grid keeps >=2 steps (v7x dual-TC).
    tile_rows = max(8, _round_up(max(1, tile_m // pack), 8))
    row_bytes = 4 * (KP + NP)                    # conservative f32 per packed row
    vmem_budget = 8 * 1024 * 1024                # per-buffer; ~2x when double-buffered
    tile_rows = min(tile_rows, max(8, (vmem_budget // row_bytes) // 8 * 8))
    if MP <= 8:
        tile_rows = MP                           # single full-extent block
    else:
        tile_rows = min(tile_rows, _round_up(MP, 8))
        if MP >= 16:
            # Keep at least two row tiles so the "parallel" axis can feed both v7x TCs.
            tile_rows = min(tile_rows, _round_up(pl.cdiv(MP, 2), 8))
    grid_m = pl.cdiv(MP, tile_rows)              # ceil grid: ragged last block handled by Pallas

    kernel = functools.partial(_linear_kernel, compute_dtype=compute_dtype)
    out = pl.pallas_call(
        kernel,
        out_shape=jax.ShapeDtypeStruct((MP, NP), out_dtype),
        grid_spec=pltpu.PrefetchScalarGridSpec(
            num_scalar_prefetch=0,
            grid=(grid_m,),
            in_specs=[
                pl.BlockSpec((tile_rows, KP), lambda i: (i, 0)),   # x row tile, full-lane
                pl.BlockSpec((KP, NP), lambda i: (0, 0)),          # weight (resident)
                pl.BlockSpec((1, NP), lambda i: (0, 0)),           # bias (resident)
            ],
            out_specs=pl.BlockSpec((tile_rows, NP), lambda i: (i, 0)),
        ),
        compiler_params=pltpu.CompilerParams(
            dimension_semantics=("parallel",),   # v7x: shard row tiles across both TCs
        ),
    )(x_in, w_in, b_in)

    out = out.reshape(M_eff, out_dims)           # free: identical byte layout
    if M_eff != M:
        out = out[:M]
    return out.reshape(*lead_shape, out_dims)


if __name__ == "__main__":
    key = jax.random.PRNGKey(0)
    k_x, k_w, k_b, k_x2 = jax.random.split(key, 4)

    in_dims, out_dims = 32, 64
    bound = 1.0 / math.sqrt(in_dims)
    weight = jax.random.uniform(k_w, (out_dims, in_dims), jnp.float32, -bound, bound)
    bias = jax.random.uniform(k_b, (out_dims,), jnp.float32, -bound, bound)

    # Small shape consistent with the module: (batch=2, seq=8, in_dims=32).
    x = jax.random.normal(k_x, (2, 8, in_dims), dtype=jnp.float32)
    y = jax.block_until_ready(distortion_transform(x, weight, bias))
    y_ref = x @ weight.T + bias
    assert y.shape == (2, 8, out_dims)
    assert jnp.allclose(y, y_ref, atol=1e-5, rtol=1e-5)

    # Ragged M (3*100=300 rows -> 75 packed rows) exercises the ceil-grid boundary
    # handling and the >=2-step parallel grid (no wrapper pad/slice passes).
    x_big = jax.random.normal(k_x2, (3, 100, in_dims), dtype=jnp.float32)
    y_big = jax.block_until_ready(distortion_transform(x_big, weight, bias))
    y_big_ref = x_big @ weight.T + bias
    assert y_big.shape == (3, 100, out_dims)
    assert jnp.allclose(y_big, y_big_ref, atol=1e-5, rtol=1e-5)

    # bf16-compute path (x cast inside the kernel; f32 accumulation) -- loose tolerance
    # accounts for bf16 rounding of x / W.
    y_bf16 = jax.block_until_ready(
        distortion_transform(x_big, weight, bias, compute_dtype=jnp.bfloat16))
    assert jnp.allclose(y_bf16, y_big_ref, atol=3e-2, rtol=3e-2)

    print("KERNEL_OK")
</pallas_src>

<mosaic_0001>
module attributes {stable_mosaic.version = 11 : i64} {
  func.func @_linear_kernel(%arg0: i32, %arg1: memref<4x128xf32, #tpu.memory_space<vmem>>, %arg2: memref<128x256xf32, #tpu.memory_space<vmem>>, %arg3: memref<1x256xf32, #tpu.memory_space<vmem>>, %arg4: memref<4x256xf32, #tpu.memory_space<vmem>>) attributes {dimension_semantics = [#tpu.dimension_semantics<parallel>], iteration_bounds = array<i64: 1>, scalar_prefetch = 0 : i64, scratch_operands = 0 : i64, tpu.core_type = #tpu.core_type<tc>, window_params = [{transform_indices = @transform_0, window_bounds = array<i64: 4, 128>}, {pipeline_mode = #tpu.pipeline_mode<synchronous>, transform_indices = @transform_1, window_bounds = array<i64: 128, 256>}, {pipeline_mode = #tpu.pipeline_mode<synchronous>, transform_indices = @transform_2, window_bounds = array<i64: 1, 256>}, {transform_indices = @transform_3, window_bounds = array<i64: 4, 256>}]} {
    %c0 = arith.constant 0 : index
    %c0_0 = arith.constant 0 : index
    %0 = vector.load %arg1[%c0, %c0_0] : memref<4x128xf32, #tpu.memory_space<vmem>>, vector<4x128xf32>
    %c0_1 = arith.constant 0 : index
    %c0_2 = arith.constant 0 : index
    %1 = vector.load %arg2[%c0_1, %c0_2] : memref<128x256xf32, #tpu.memory_space<vmem>>, vector<128x256xf32>
    %cst = arith.constant dense<0.000000e+00> : vector<4x256xf32>
    %2 = tpu.matmul %0, %1, %cst {dimension_numbers = #tpu.dot_dimension_numbers<[1], [0], [0], [1], [0, 0, 1, 1], [], []>} : vector<4x128xf32>, vector<128x256xf32>, vector<4x256xf32> -> vector<4x256xf32>
    %c0_3 = arith.constant 0 : index
    %c0_4 = arith.constant 0 : index
    %3 = vector.load %arg3[%c0_3, %c0_4] : memref<1x256xf32, #tpu.memory_space<vmem>>, vector<1x256xf32>
    %4 = vector.broadcast %3 : vector<1x256xf32> to vector<4x256xf32>
    %5 = arith.addf %2, %4 : vector<4x256xf32>
    %c0_5 = arith.constant 0 : index
    %c0_6 = arith.constant 0 : index
    %6 = vector.load %arg4[%c0_5, %c0_6] : memref<4x256xf32, #tpu.memory_space<vmem>>, vector<4x256xf32>
    tpu.vector_store %arg4[%c0_5, %c0_6], %5 {strides = array<i32>} : memref<4x256xf32, #tpu.memory_space<vmem>>, vector<4x256xf32>,
    return
  }
  func.func @transform_0(%arg0: i32) -> (i32, i32) {
    %c0_i32 = arith.constant 0 : i32
    %c0_i32_0 = arith.constant 0 : i32
    return %arg0, %c0_i32 : i32, i32
  }
  func.func @transform_1(%arg0: i32) -> (i32, i32) {
    %c0_i32 = arith.constant 0 : i32
    %c0_i32_0 = arith.constant 0 : i32
    %c0_i32_1 = arith.constant 0 : i32
    return %c0_i32, %c0_i32_0 : i32, i32
  }
  func.func @transform_2(%arg0: i32) -> (i32, i32) {
    %c0_i32 = arith.constant 0 : i32
    %c0_i32_0 = arith.constant 0 : i32
    %c0_i32_1 = arith.constant 0 : i32
    return %c0_i32, %c0_i32_0 : i32, i32
  }
  func.func @transform_3(%arg0: i32) -> (i32, i32) {
    %c0_i32 = arith.constant 0 : i32
    %c0_i32_0 = arith.constant 0 : i32
    return %arg0, %c0_i32 : i32, i32
  }
}

</mosaic_0001>

<bundles_post_ra>
// kernel: tpu_custom_call.1
= control target key start
LH: loop header
LB: loop body
LE: loop exit
PB: predicated region body
PF: predicated region fallthrough
CT: control target
= control target key end

     0   :  { %8 = vsyncpa [#allocation3], 0  ;;  %s360_s0 = inlined_call_operand.hbm [shape: f32[4,128], index: 0, kind: input, shape index: {}]   ;;  %s361_s1 = inlined_call_operand.hbm [shape: f32[128,256], index: 1, kind: input, shape index: {}]   ;;  %s362_s2 = inlined_call_operand.vmem [shape: f32[1,256], index: 2, kind: input, shape index: {}]   ;;  %s363_s3 = inlined_call_operand.hbm [shape: f32[4,256], index: 3, kind: output, shape index: {}]  }
   0x1   :  { %9 = vsyncpa [#allocation6], 0 }
   0x2   :  { %10 = vsyncpa [#allocation4], 0  ;;  %s288_s12 = smov [#allocation2]   ;;  %s289_s14 = smov [#allocation5]  }
   0x3   :  { %s17_s13 = sshll.u32 %s288_s12, 4  ;;  %s26_s15 = sshll.u32 %s289_s14, 4  ;;  %s18_s13 = int_to_ptr.vmem [resolvable:$true] %s17_s13  ;;  %s314_s15 = int_to_ptr.vmem [resolvable:$true] %s26_s15 }
   0x4   :  { %s216_s18 = scalar_lea.hbm %s360_s0, 64 }
   0x5   :  { %p217_p0 = scmp.ne.s32.totalorder %s360_s0, %s216_s18  ;;  %p220_p1 = scmp.lt.u32.totalorder %s216_s18, %s360_s0 }
   0x7   :  { %p222_p2 = pnand %p220_p1, %p217_p0 }
   0x9   :  { %225 = shalt.err (!%p222_p2)
}
   0xa   :  { %s226_s23 = scalar_lea.vmem %s18_s13, 64  ;;  %p231_p4 = scmp.lt.s32.totalorder %s18_s13, %s18_s13 }
   0xb   :  { %p227_p3 = scmp.ne.s32.totalorder %s18_s13, %s226_s23  ;;  %p232_p5 = scmp.lt.s32.totalorder %s226_s23, %s226_s23 }
   0xd   :  { %p233_p6 = por %p232_p5, %p231_p4 }
   0xf   :  { %p234_p7 = pnand %p233_p6, %p227_p3 }
  0x11   :  { %237 = shalt.err (!%p234_p7)
}
  0x12   :  { %20 = dma.hbm_to_vmem [thread:$0]  %s360_s0, 64, %s18_s13, [#allocation3]  }
  0x13   :  { %s238_s28 = scalar_lea.hbm %s361_s1, 4096 }
  0x14   :  { %p239_p8 = scmp.ne.s32.totalorder %s361_s1, %s238_s28  ;;  %p242_p9 = scmp.lt.u32.totalorder %s238_s28, %s361_s1 }
  0x16   :  { %p244_p10 = pnand %p242_p9, %p239_p8 }
  0x18   :  { %247 = shalt.err (!%p244_p10)
}
  0x19   :  { %s248_s6 = scalar_lea.vmem %s314_s15, 4096  ;;  %p253_p12 = scmp.lt.s32.totalorder %s314_s15, %s314_s15 }
  0x1a   :  { %p249_p11 = scmp.ne.s32.totalorder %s314_s15, %s248_s6  ;;  %p254_p13 = scmp.lt.s32.totalorder %s248_s6, %s248_s6 }
  0x1c   :  { %p255_p0 = por %p254_p13, %p253_p12 }
  0x1e   :  { %p256_p1 = pnand %p255_p0, %p249_p11 }
  0x20   :  { %259 = shalt.err (!%p256_p1)
}
  0x21   :  { %s290_s0 = smov 256   ;;  %s291_s7 = smov 16  }
  0x22   :  { %32 = dma.hbm_to_vmem [thread:$0]  %s361_s1, 4096, %s314_s15, [#allocation6], %s290_s0, %s290_s0, %s291_s7  }
  0x23   :  { %282 = dma.done.wait [#allocation3], 64  }
  0x24   :  { %283 = vsyncadd [#allocation3], 4294967232 }
  0x25   :  { %284 = dma.done.wait [#allocation6], 4096  }
  0x26   :  { %285 = vsyncadd [#allocation6], 4294963200  ;;  %v292_v0 = vmov 0.0   ;;  %v43_v1 = vld [vmem:[#allocation5 + $0x8] sm:$0xff]  ;;  %v45_v2 = vld [vmem:[#allocation5 + $0x18] sm:$0xff]  ;;  %v76_v50 = vlaneseq  ;;  %s293_s11 = smov [#allocation7]  }
  0x27   :  { %150 = vmatprep.mubr.f32.mxu0 %v292_v0  ;;  %v42_v3 = vld [vmem:[#allocation5] sm:$0xff]  ;;  %v178_v4 = vpack.c.bf16 %v45_v2, %v43_v1  ;;  %v44_v5 = vld [vmem:[#allocation5 + $0x10] sm:$0xff]  ;;  %v47_v6 = vld [vmem:[#allocation5 + $0x28] sm:$0xff]  ;;  %s168_s12 = sshll.u32 %s293_s11, 4  ;;  %s169_s12 = int_to_ptr.vmem [resolvable:$true] %s168_s12 }
  0x28   :  { %v49_v7 = vld [vmem:[#allocation5 + $0x38] sm:$0xff]  ;;  %v180_v8 = vpack.c.bf16 %v44_v5, %v42_v3  ;;  %v46_v10 = vld [vmem:[#allocation5 + $0x20] sm:$0xff]  ;;  %v48_v11 = vld [vmem:[#allocation5 + $0x30] sm:$0xff]  ;;  %v77_v51 = vshrl.u32 %v76_v50, 7  ;;  %s260_s13 = scalar_lea.vmem %s169_s12, 128  ;;  %p265_p3 = scmp.lt.s32.totalorder %s169_s12, %s169_s12 }
  0x29   :  { %v182_v9 = vpack.c.bf16 %v49_v7, %v47_v6  ;;  %v51_v12 = vld [vmem:[#allocation5 + $0x48] sm:$0xff]  ;;  %179 = vmatprep.subr.bf16.mxu0 %v178_v4  ;;  %v53_v13 = vld [vmem:[#allocation5 + $0x58] sm:$0xff]  ;;  %v184_v14 = vpack.c.bf16 %v48_v11, %v46_v10  ;;  %v50_v16 = vld [vmem:[#allocation5 + $0x40] sm:$0xff]  ;;  %p261_p2 = scmp.ne.s32.totalorder %s169_s12, %s260_s13  ;;  %p266_p4 = scmp.lt.s32.totalorder %s260_s13, %s260_s13 }
  0x2a   :  { %181 = vmatpush1.bf16.msra.mxu0 %v180_v8  ;;  %v186_v15 = vpack.c.bf16 %v53_v13, %v51_v12  ;;  %v52_v17 = vld [vmem:[#allocation5 + $0x50] sm:$0xff]  ;;  %v55_v18 = vld [vmem:[#allocation5 + $0x68] sm:$0xff]  ;;  %v57_v19 = vld [vmem:[#allocation5 + $0x78] sm:$0xff]  ;;  %v78_v52 = vsub.s32 0, %v77_v51  ;;  %v82_v54 = vsub.s32 1, %v77_v51 }
  0x2b   :  { %183 = vmatprep.subr.bf16.mxu0 %v182_v9  ;;  %v188_v20 = vpack.c.bf16 %v52_v17, %v50_v16  ;;  %v190_v21 = vpack.c.bf16 %v57_v19, %v55_v18  ;;  %v54_v22 = vld [vmem:[#allocation5 + $0x60] sm:$0xff]  ;;  %v56_v23 = vld [vmem:[#allocation5 + $0x70] sm:$0xff]  ;;  %v59_v24 = vld [vmem:[#allocation5 + $0x88] sm:$0xff]  ;;  %p267_p5 = por %p266_p4, %p265_p3 }
  0x2c   :  { %v61_v25 = vld [vmem:[#allocation5 + $0x98] sm:$0xff]  ;;  %v192_v26 = vpack.c.bf16 %v56_v23, %v54_v22  ;;  %v58_v28 = vld [vmem:[#allocation5 + $0x80] sm:$0xff]  ;;  %v60_v29 = vld [vmem:[#allocation5 + $0x90] sm:$0xff] }
  0x2d   :  { %v194_v27 = vpack.c.bf16 %v61_v25, %v59_v24  ;;  %v63_v30 = vld [vmem:[#allocation5 + $0xa8] sm:$0xff]  ;;  %v65_v31 = vld [vmem:[#allocation5 + $0xb8] sm:$0xff]  ;;  %v196_v32 = vpack.c.bf16 %v60_v29, %v58_v28  ;;  %v62_v34 = vld [vmem:[#allocation5 + $0xa0] sm:$0xff]  ;;  %p268_p6 = pnand %p267_p5, %p261_p2 }
  0x2e   :  { %185 = vmatpush1.bf16.msra.mxu0 %v184_v14  ;;  %v198_v33 = vpack.c.bf16 %v65_v31, %v63_v30  ;;  %v64_v35 = vld [vmem:[#allocation5 + $0xb0] sm:$0xff]  ;;  %v67_v36 = vld [vmem:[#allocation5 + $0xc8] sm:$0xff]  ;;  %v69_v37 = vld [vmem:[#allocation5 + $0xd8] sm:$0xff] }
  0x2f   :  { %187 = vmatprep.subr.bf16.mxu0 %v186_v15  ;;  %v200_v38 = vpack.c.bf16 %v64_v35, %v62_v34  ;;  %v202_v39 = vpack.c.bf16 %v69_v37, %v67_v36  ;;  %v66_v40 = vld [vmem:[#allocation5 + $0xc0] sm:$0xff]  ;;  %v68_v41 = vld [vmem:[#allocation5 + $0xd0] sm:$0xff]  ;;  %v71_v42 = vld [vmem:[#allocation5 + $0xe8] sm:$0xff] }
  0x30   :  { %v73_v43 = vld [vmem:[#allocation5 + $0xf8] sm:$0xff]  ;;  %v204_v44 = vpack.c.bf16 %v68_v41, %v66_v40  ;;  %v70_v46 = vld [vmem:[#allocation5 + $0xe0] sm:$0xff]  ;;  %v72_v47 = vld [vmem:[#allocation5 + $0xf0] sm:$0xff] }
  0x31   :  { %v206_v45 = vpack.c.bf16 %v73_v43, %v71_v42  ;;  %v208_v48 = vpack.c.bf16 %v72_v47, %v70_v46  ;;  %v41_v49 = vld [vmem:[#allocation2] sm:$0xf] }
  0x32   :  { %189 = vmatpush1.bf16.msra.mxu0 %v188_v20  ;;  %v74_v53 = vld [vmem:[%s362_s2] sm:$0x3] }
  0x33   :  { %191 = vmatprep.subr.bf16.mxu0 %v190_v21  ;;  %v79_v55 = vrot.slane %v74_v53, %v78_v52  ;;  %v83_v56 = vrot.slane %v74_v53, %v82_v54 }
  0x36   :  { %193 = vmatpush1.bf16.msra.mxu0 %v192_v26 }
  0x37   :  { %195 = vmatprep.subr.bf16.mxu0 %v194_v27 }
  0x3a   :  { %197 = vmatpush1.bf16.msra.mxu0 %v196_v32 }
  0x3b   :  { %199 = vmatprep.subr.bf16.mxu0 %v198_v33 }
  0x3e   :  { %201 = vmatpush1.bf16.msra.mxu0 %v200_v38 }
  0x3f   :  { %203 = vmatprep.subr.bf16.mxu0 %v202_v39 }
  0x42   :  { %205 = vmatpush1.bf16.msra.mxu0 %v204_v44 }
  0x43   :  { %207 = vmatprep.subr.bf16.mxu0 %v206_v45 }
  0x46   :  { %209 = vmatpush1.bf16.msra.mxu0 %v208_v48 }
  0x49   :  { %151 = vmatmul.mubr.f32.vlgmr.msra.gmra.mrb[0].mxu0 %v41_v49 }
 0x11c   :  { %v152_v57 = vpop.f32.mrb[0].mxu0 }
 0x11d   :  { %v153_v58 = vadd.f32 %v152_v57, %v79_v55  ;;  %v154_v59 = vpop.f32.mrb[1].mxu0 }
 0x11e   :  { %v155_v60 = vadd.f32 %v154_v59, %v83_v56 }
 0x120   :  { %v159_v61 = vcombine.low %v153_v58, %v155_v60 }
 0x122   :  { %161 = vst [vmem:[#allocation7] sm:$0xff] %v159_v61 }
 0x123   :  { %271 = shalt.err (!%p268_p6)
}
 0x124   :  { %s272_s15 = scalar_lea.hbm %s363_s3, 128 }
 0x125   :  { %p273_p7 = scmp.ne.s32.totalorder %s363_s3, %s272_s15  ;;  %p276_p8 = scmp.lt.u32.totalorder %s272_s15, %s363_s3 }
 0x127   :  { %p278_p9 = pnand %p276_p8, %p273_p7 }
 0x129   :  { %281 = shalt.err (!%p278_p9)
}
 0x12a   :  { %171 = dma.vmem_to_hbm [thread:$0]  %s169_s12, 128, %s363_s3, [#allocation4]  }
 0x12b   :  { %286 = dma.done.wait [#allocation4], 128  }
 0x12c   :  { %287 = vsyncadd [#allocation4], 4294967168 }
 0x12d   :  { %175 = vsyncpa [#allocation3], 1 }
 0x12e   :  { %176 = vsyncpa [#allocation6], 1 }
 0x12f   :  { %177 = vsyncpa [#allocation4], 1 }

</bundles_post_ra>
